<compile_context>
chip_gen: v7x
topology: tpu7x:2x2x1
jax: 0.10.0
libtpu: 0.0.40
codegen_flags: <defaults>
</compile_context>

<pallas_src>
import functools
import math

import jax
import jax.numpy as jnp
from jax.experimental import pallas as pl
from jax.experimental.pallas import tpu as pltpu


def _round_up(x, m):
    return ((x + m - 1) // m) * m


def _pad2d(a, rows, cols):
    pr, pc = rows - a.shape[0], cols - a.shape[1]
    if pr == 0 and pc == 0:
        return a
    return jnp.pad(a, ((0, pr), (0, pc)))


def _vmem_capacity_bytes():
    try:
        return int(pltpu.get_tpu_info().vmem_capacity_bytes)
    except Exception:
        return 64 << 20  # assume the smallest generation (v7x per-core VMEM)


def gcn_kernel(adj_ref, x_ref, w_ref, b_ref, o_ref, acc_ref, *, tk, x_resident):
    """Accumulate (adj @ x) over the reduction axis; finalize with @ W + bias.

    adj_ref: (tm, tk)                     x_ref: (n_cols_p, F_in_p) if resident
                                                 else (tk, F_in_p)
    w_ref:   (F_in_p, F_out_p)            b_ref: (1, F_out_p)
    o_ref:   (tm, F_out_p)                acc_ref: (tm, F_in_p) f32 scratch
    """
    k = pl.program_id(1)

    @pl.when(k == 0)
    def _init():
        acc_ref[...] = jnp.zeros_like(acc_ref)

    if x_resident:
        # x lives in VMEM once (constant index_map); slice the k-th chunk here.
        start = pl.multiple_of(k * tk, 128)
        x_blk = x_ref[pl.ds(start, tk), :]
    else:
        x_blk = x_ref[...]

    # Inner loop is pure MXU + DMA: adj_tile @ x_tile accumulated in f32.
    acc_ref[...] += jnp.dot(adj_ref[...], x_blk, preferred_element_type=jnp.float32)

    @pl.when(k == pl.num_programs(1) - 1)
    def _finalize():
        # Projection and bias applied once per row tile (not per k step);
        # single lane-dense (tm, F_out_p) store.
        out = jnp.dot(acc_ref[...], w_ref[...], preferred_element_type=jnp.float32)
        o_ref[...] = (out + b_ref[...]).astype(o_ref.dtype)


def graph_convolution(x, adj, weight, bias, *, stream_dtype=None):
    """Pallas GCN layer forward: adj @ (x @ weight) + bias.

    x:      (N, F_in)     float32
    adj:    (N, N)        float32
    weight: (F_in, F_out) float32
    bias:   (F_out,)      float32 or None
    stream_dtype: dtype used to stream adj/x through HBM->MXU (f32 default,
                  jnp.bfloat16 halves the dominant HBM traffic; accumulation
                  stays f32 either way).
    returns (N, F_out)    float32
    """
    n, f_in = x.shape
    f_out = weight.shape[1]
    out_dtype = x.dtype
    stream_dtype = out_dtype if stream_dtype is None else stream_dtype
    esize = jnp.dtype(stream_dtype).itemsize

    vmem_cap = _vmem_capacity_bytes()
    big_vmem = vmem_cap >= (96 << 20)  # v5e/v6e (128 MiB) vs v7x (64 MiB)

    # --- Tile sizes & padding (pad N to the tiles, not just to 128). --------
    f_in_p = _round_up(f_in, 128)
    f_out_p = _round_up(f_out, 128)
    n128 = _round_up(n, 128)

    tk = min(2048 if big_vmem else 1024, n128)   # reduction (adj column) tile
    tm = min(512, n128)                          # output row tile
    if tm >= 256 and _round_up(n, tm) // tm < 2:
        tm //= 2  # keep >=2 row tiles so the parallel axis feeds both v7x cores

    n_rows_p = _round_up(n, tm)
    n_cols_p = _round_up(n, tk)

    # Resident x removes the per-row-tile re-streaming (constant index_map ->
    # one DMA for the whole grid). Budget it per generation.
    x_budget = (32 << 20) if big_vmem else (12 << 20)
    x_resident = 2 * n_cols_p * f_in_p * esize <= x_budget

    adj_p = _pad2d(adj, n_rows_p, n_cols_p).astype(stream_dtype)
    x_p = _pad2d(x, n_cols_p, f_in_p).astype(stream_dtype)
    w_p = _pad2d(weight, f_in_p, f_out_p).astype(jnp.float32)
    if bias is None:
        b_p = jnp.zeros((1, f_out_p), jnp.float32)  # bias=None folded as zero bias
    else:
        b_p = _pad2d(bias.reshape(1, f_out), 1, f_out_p).astype(jnp.float32)

    grid = (n_rows_p // tm, n_cols_p // tk)

    if x_resident:
        x_spec = pl.BlockSpec((n_cols_p, f_in_p), lambda i, k: (0, 0))
    else:
        # TODO(synk): for huge graphs the streamed x could stay unpadded (tk, F_in)
        # to cut its replay bytes 16x; adj traffic dominates so we keep it padded.
        x_spec = pl.BlockSpec((tk, f_in_p), lambda i, k: (k, 0))

    # --- Explicit VMEM budget. -----------------------------------------------
    x_vmem = (2 * n_cols_p * f_in_p if x_resident else 2 * tk * f_in_p) * esize
    vmem_bytes = (
        2 * tm * tk * esize                       # adj tile (double-buffered)
        + x_vmem                                  # x (resident or streamed tile)
        + 2 * (f_in_p * f_out_p + f_out_p) * 4    # weight + bias blocks
        + 2 * tm * f_out_p * 4                    # output tile
        + tm * f_in_p * 4                         # f32 accumulator scratch
    )
    vmem_limit = int(min(max(vmem_bytes + (4 << 20), 16 << 20), 64 << 20))

    x_passes = 1 if x_resident else (n_rows_p // tm)
    cost = pl.CostEstimate(
        flops=2 * n_rows_p * n_cols_p * f_in_p + 2 * n_rows_p * f_in_p * f_out_p,
        transcendentals=0,
        bytes_accessed=int(
            n_rows_p * n_cols_p * esize               # adj (dominant stream)
            + x_passes * n_cols_p * f_in_p * esize    # x (replayed only if streamed)
            + (f_in_p * f_out_p + f_out_p) * 4        # weight + bias
            + n_rows_p * f_out_p * 4                  # output
        ),
    )

    kernel = functools.partial(gcn_kernel, tk=tk, x_resident=x_resident)

    out_p = pl.pallas_call(
        kernel,
        out_shape=jax.ShapeDtypeStruct((n_rows_p, f_out_p), out_dtype),
        grid_spec=pltpu.PrefetchScalarGridSpec(
            num_scalar_prefetch=0,
            grid=grid,
            in_specs=[
                pl.BlockSpec((tm, tk), lambda i, k: (i, k)),           # adj tile
                x_spec,                                                 # x (resident or streamed)
                pl.BlockSpec((f_in_p, f_out_p), lambda i, k: (0, 0)),   # weight (resident)
                pl.BlockSpec((1, f_out_p), lambda i, k: (0, 0)),        # bias (resident)
            ],
            out_specs=pl.BlockSpec((tm, f_out_p), lambda i, k: (i, 0)),
            scratch_shapes=[pltpu.VMEM((tm, f_in_p), jnp.float32)],
        ),
        compiler_params=pltpu.CompilerParams(
            dimension_semantics=("parallel", "arbitrary"),
            vmem_limit_bytes=vmem_limit,
        ),
        cost_estimate=cost,
    )(adj_p, x_p, w_p, b_p)

    return out_p[:n, :f_out]


if __name__ == "__main__":
    key = jax.random.PRNGKey(0)
    k_x, k_adj, k_w, k_b, k_x2, k_adj2, k_w2, k_b2 = jax.random.split(key, 8)

    # ---- Test 1: small module-consistent shapes (N=16, 8 -> 32), with bias --
    N, F_IN, F_OUT = 16, 8, 32
    x = jax.random.normal(k_x, (N, F_IN), dtype=jnp.float32)
    a = jax.random.uniform(k_adj, (N, N), dtype=jnp.float32)
    adj = (a + a.T) * 0.5  # symmetric deterministic adjacency

    # reset_parameters(): uniform(-stdv, stdv), stdv = 1/sqrt(out_features)
    stdv = 1.0 / math.sqrt(F_OUT)
    weight = jax.random.uniform(
        k_w, (F_IN, F_OUT), minval=-stdv, maxval=stdv, dtype=jnp.float32
    )
    bias = jax.random.uniform(
        k_b, (F_OUT,), minval=-stdv, maxval=stdv, dtype=jnp.float32
    )

    out = jax.block_until_ready(graph_convolution(x, adj, weight, bias))
    ref = adj @ (x @ weight) + bias
    assert out.shape == (N, F_OUT)
    assert jnp.allclose(out, ref, atol=2e-3, rtol=2e-3), float(
        jnp.max(jnp.abs(out - ref))
    )

    # ---- Test 2: non-128-multiple N, multi-row-tile grid, bias=None, f32 ----
    N2, F_IN2, F_OUT2 = 320, 8, 32
    x2 = jax.random.normal(k_x2, (N2, F_IN2), dtype=jnp.float32)
    a2 = jax.random.uniform(k_adj2, (N2, N2), dtype=jnp.float32)
    adj2 = (a2 + a2.T) * 0.5
    stdv2 = 1.0 / math.sqrt(F_OUT2)
    w2 = jax.random.uniform(
        k_w2, (F_IN2, F_OUT2), minval=-stdv2, maxval=stdv2, dtype=jnp.float32
    )

    out2 = jax.block_until_ready(graph_convolution(x2, adj2, w2, None))
    ref2 = adj2 @ (x2 @ w2)
    assert out2.shape == (N2, F_OUT2)
    assert jnp.allclose(out2, ref2, atol=2e-3, rtol=2e-3), float(
        jnp.max(jnp.abs(out2 - ref2))
    )

    # ---- Test 3: bf16-streamed adj/x (f32 accumulation), with bias ----------
    b2 = jax.random.uniform(
        k_b2, (F_OUT2,), minval=-stdv2, maxval=stdv2, dtype=jnp.float32
    )
    out3 = jax.block_until_ready(
        graph_convolution(x2, adj2, w2, b2, stream_dtype=jnp.bfloat16)
    )
    ref3 = ref2 + b2
    assert out3.shape == (N2, F_OUT2)
    assert jnp.allclose(out3, ref3, atol=6e-2, rtol=6e-2), float(
        jnp.max(jnp.abs(out3 - ref3))
    )

    print("KERNEL_OK")
</pallas_src>

<mosaic_0001>
module attributes {stable_mosaic.version = 11 : i64} {
  func.func @gcn_kernel(%arg0: i32, %arg1: i32, %arg2: memref<128x128xf32, #tpu.memory_space<vmem>>, %arg3: memref<128x128xf32, #tpu.memory_space<vmem>>, %arg4: memref<128x128xf32, #tpu.memory_space<vmem>>, %arg5: memref<1x128xf32, #tpu.memory_space<vmem>>, %arg6: memref<128x128xf32, #tpu.memory_space<vmem>>, %arg7: memref<128x128xf32, #tpu.memory_space<vmem>>) attributes {dimension_semantics = [#tpu.dimension_semantics<parallel>, #tpu.dimension_semantics<arbitrary>], iteration_bounds = array<i64: 1, 1>, scalar_prefetch = 0 : i64, scratch_operands = 1 : i64, tpu.core_type = #tpu.core_type<tc>, window_params = [{transform_indices = @transform_0, window_bounds = array<i64: 128, 128>}, {pipeline_mode = #tpu.pipeline_mode<synchronous>, transform_indices = @transform_1, window_bounds = array<i64: 128, 128>}, {pipeline_mode = #tpu.pipeline_mode<synchronous>, transform_indices = @transform_2, window_bounds = array<i64: 128, 128>}, {pipeline_mode = #tpu.pipeline_mode<synchronous>, transform_indices = @transform_3, window_bounds = array<i64: 1, 128>}, {transform_indices = @transform_4, window_bounds = array<i64: 128, 128>}]} {
    %c0_i32 = arith.constant 0 : i32
    %0 = arith.cmpi eq, %arg1, %c0_i32 : i32
    %1 = arith.extui %0 : i1 to i32
    %c0_i32_0 = arith.constant 0 : i32
    %2 = arith.cmpi ne, %1, %c0_i32_0 : i32
    scf.if %2 {
      %cst_9 = arith.constant 0.000000e+00 : f32
      %15 = vector.broadcast %cst_9 : f32 to vector<128x128xf32>
      %c0_10 = arith.constant 0 : index
      %c0_11 = arith.constant 0 : index
      %16 = vector.load %arg7[%c0_10, %c0_11] : memref<128x128xf32, #tpu.memory_space<vmem>>, vector<128x128xf32>
      tpu.vector_store %arg7[%c0_10, %c0_11], %15 {strides = array<i32>} : memref<128x128xf32, #tpu.memory_space<vmem>>, vector<128x128xf32>,
    } else {
    }
    %c128_i32 = arith.constant 128 : i32
    %3 = arith.muli %arg1, %c128_i32 : i32
    %4 = tpu.assume_multiple %3, 128 : i32
    %5 = arith.index_cast %4 : i32 to index
    %c0 = arith.constant 0 : index
    %6 = vector.load %arg3[%5, %c0] : memref<128x128xf32, #tpu.memory_space<vmem>>, vector<128x128xf32>
    %c0_1 = arith.constant 0 : index
    %c0_2 = arith.constant 0 : index
    %7 = vector.load %arg7[%c0_1, %c0_2] : memref<128x128xf32, #tpu.memory_space<vmem>>, vector<128x128xf32>
    %c0_3 = arith.constant 0 : index
    %c0_4 = arith.constant 0 : index
    %8 = vector.load %arg2[%c0_3, %c0_4] : memref<128x128xf32, #tpu.memory_space<vmem>>, vector<128x128xf32>
    %cst = arith.constant dense<0.000000e+00> : vector<128x128xf32>
    %9 = tpu.matmul %8, %6, %cst {dimension_numbers = #tpu.dot_dimension_numbers<[1], [0], [0], [1], [0, 0, 1, 1], [], []>} : vector<128x128xf32>, vector<128x128xf32>, vector<128x128xf32> -> vector<128x128xf32>
    %10 = arith.addf %7, %9 : vector<128x128xf32>
    %c0_5 = arith.constant 0 : index
    %c0_6 = arith.constant 0 : index
    %11 = vector.load %arg7[%c0_5, %c0_6] : memref<128x128xf32, #tpu.memory_space<vmem>>, vector<128x128xf32>
    tpu.vector_store %arg7[%c0_5, %c0_6], %10 {strides = array<i32>} : memref<128x128xf32, #tpu.memory_space<vmem>>, vector<128x128xf32>,
    %c0_i32_7 = arith.constant 0 : i32
    %12 = arith.cmpi eq, %arg1, %c0_i32_7 : i32
    %13 = arith.extui %12 : i1 to i32
    %c0_i32_8 = arith.constant 0 : i32
    %14 = arith.cmpi ne, %13, %c0_i32_8 : i32
    scf.if %14 {
      %c0_9 = arith.constant 0 : index
      %c0_10 = arith.constant 0 : index
      %15 = vector.load %arg7[%c0_9, %c0_10] : memref<128x128xf32, #tpu.memory_space<vmem>>, vector<128x128xf32>
      %c0_11 = arith.constant 0 : index
      %c0_12 = arith.constant 0 : index
      %16 = vector.load %arg4[%c0_11, %c0_12] : memref<128x128xf32, #tpu.memory_space<vmem>>, vector<128x128xf32>
      %cst_13 = arith.constant dense<0.000000e+00> : vector<128x128xf32>
      %17 = tpu.matmul %15, %16, %cst_13 {dimension_numbers = #tpu.dot_dimension_numbers<[1], [0], [0], [1], [0, 0, 1, 1], [], []>} : vector<128x128xf32>, vector<128x128xf32>, vector<128x128xf32> -> vector<128x128xf32>
      %c0_14 = arith.constant 0 : index
      %c0_15 = arith.constant 0 : index
      %18 = vector.load %arg5[%c0_14, %c0_15] : memref<1x128xf32, #tpu.memory_space<vmem>>, vector<1x128xf32>
      %19 = vector.broadcast %18 : vector<1x128xf32> to vector<128x128xf32>
      %20 = arith.addf %17, %19 : vector<128x128xf32>
      %c0_16 = arith.constant 0 : index
      %c0_17 = arith.constant 0 : index
      %21 = vector.load %arg6[%c0_16, %c0_17] : memref<128x128xf32, #tpu.memory_space<vmem>>, vector<128x128xf32>
      tpu.vector_store %arg6[%c0_16, %c0_17], %20 {strides = array<i32>} : memref<128x128xf32, #tpu.memory_space<vmem>>, vector<128x128xf32>,
    } else {
    }
    return
  }
  func.func @transform_0(%arg0: i32, %arg1: i32) -> (i32, i32) {
    %c0_i32 = arith.constant 0 : i32
    return %arg0, %arg1 : i32, i32
  }
  func.func @transform_1(%arg0: i32, %arg1: i32) -> (i32, i32) {
    %c0_i32 = arith.constant 0 : i32
    %c0_i32_0 = arith.constant 0 : i32
    %c0_i32_1 = arith.constant 0 : i32
    return %c0_i32, %c0_i32_0 : i32, i32
  }
  func.func @transform_2(%arg0: i32, %arg1: i32) -> (i32, i32) {
    %c0_i32 = arith.constant 0 : i32
    %c0_i32_0 = arith.constant 0 : i32
    %c0_i32_1 = arith.constant 0 : i32
    return %c0_i32, %c0_i32_0 : i32, i32
  }
  func.func @transform_3(%arg0: i32, %arg1: i32) -> (i32, i32) {
    %c0_i32 = arith.constant 0 : i32
    %c0_i32_0 = arith.constant 0 : i32
    %c0_i32_1 = arith.constant 0 : i32
    return %c0_i32, %c0_i32_0 : i32, i32
  }
  func.func @transform_4(%arg0: i32, %arg1: i32) -> (i32, i32) {
    %c0_i32 = arith.constant 0 : i32
    %c0_i32_0 = arith.constant 0 : i32
    return %arg0, %c0_i32 : i32, i32
  }
}

</mosaic_0001>

<bundles_post_ra>
// kernel: tpu_custom_call.1
= control target key start
LH: loop header
LB: loop body
LE: loop exit
PB: predicated region body
PF: predicated region fallthrough
CT: control target
= control target key end

     0   :  { %9 = vsyncpa [#allocation4], 0  ;;  %s969_s0 = inlined_call_operand.hbm [shape: f32[128,128], index: 0, kind: input, shape index: {}]   ;;  %s970_s1 = inlined_call_operand.hbm [shape: f32[128,128], index: 1, kind: input, shape index: {}]   ;;  %s971_s2 = inlined_call_operand.hbm [shape: f32[128,128], index: 2, kind: input, shape index: {}]   ;;  %s972_s3 = inlined_call_operand.vmem [shape: f32[1,128], index: 3, kind: input, shape index: {}]   ;;  %s973_s4 = inlined_call_operand.hbm [shape: f32[128,128], index: 4, kind: output, shape index: {}]  }
   0x1   :  { %10 = vsyncpa [#allocation7], 0 }
   0x2   :  { %11 = vsyncpa [#allocation5], 0  ;;  %s868_s15 = smov [#allocation6]   ;;  %s869_s17 = smov [#allocation3]  }
   0x3   :  { %s29_s16 = sshll.u32 %s868_s15, 4  ;;  %s17_s18 = sshll.u32 %s869_s17, 4  ;;  %s30_s16 = int_to_ptr.vmem [resolvable:$true] %s29_s16  ;;  %s899_s18 = int_to_ptr.vmem [resolvable:$true] %s17_s18 }
   0x4   :  { %s774_s21 = scalar_lea.hbm %s970_s1, 2048 }
   0x5   :  { %p775_p0 = scmp.ne.s32.totalorder %s970_s1, %s774_s21  ;;  %p778_p1 = scmp.lt.u32.totalorder %s774_s21, %s970_s1 }
   0x7   :  { %p780_p2 = pnand %p778_p1, %p775_p0 }
   0x9   :  { %783 = shalt.err (!%p780_p2)
}
   0xa   :  { %s784_s26 = scalar_lea.vmem %s30_s16, 2048  ;;  %p789_p4 = scmp.lt.s32.totalorder %s30_s16, %s30_s16 }
   0xb   :  { %p785_p3 = scmp.ne.s32.totalorder %s30_s16, %s784_s26  ;;  %p790_p5 = scmp.lt.s32.totalorder %s784_s26, %s784_s26 }
   0xd   :  { %p791_p6 = por %p790_p5, %p789_p4 }
   0xf   :  { %p792_p7 = pnand %p791_p6, %p785_p3 }
  0x11   :  { %795 = shalt.err (!%p792_p7)
}
  0x12   :  { %s870_s27 = smov 128   ;;  %s871_s28 = smov 8  }
  0x13   :  { %35 = dma.hbm_to_vmem [thread:$0]  %s970_s1, 2048, %s30_s16, [#allocation7], %s870_s27, %s870_s27, %s871_s28  }
  0x14   :  { %s796_s7 = scalar_lea.hbm %s969_s0, 2048 }
  0x15   :  { %p797_p8 = scmp.ne.s32.totalorder %s969_s0, %s796_s7  ;;  %p800_p9 = scmp.lt.u32.totalorder %s796_s7, %s969_s0 }
  0x17   :  { %p802_p10 = pnand %p800_p9, %p797_p8 }
  0x19   :  { %805 = shalt.err (!%p802_p10)
}
  0x1a   :  { %s806_s12 = scalar_lea.vmem %s899_s18, 2048  ;;  %p811_p12 = scmp.lt.s32.totalorder %s899_s18, %s899_s18 }
  0x1b   :  { %p807_p11 = scmp.ne.s32.totalorder %s899_s18, %s806_s12  ;;  %p812_p13 = scmp.lt.s32.totalorder %s806_s12, %s806_s12 }
  0x1d   :  { %p813_p0 = por %p812_p13, %p811_p12 }
  0x1f   :  { %p814_p1 = pnand %p813_p0, %p807_p11 }
  0x21   :  { %817 = shalt.err (!%p814_p1)
}
  0x22   :  { %23 = dma.hbm_to_vmem [thread:$0]  %s969_s0, 2048, %s899_s18, [#allocation4], %s870_s27, %s870_s27, %s871_s28  }
  0x23   :  { %s872_s14 = smov [#allocation8]   ;;  %s818_s19 = scalar_lea.hbm %s971_s2, 2048 }
  0x24   :  { %s41_s15 = sshll.u32 %s872_s14, 4  ;;  %p819_p2 = scmp.ne.s32.totalorder %s971_s2, %s818_s19  ;;  %s42_s15 = int_to_ptr.vmem [resolvable:$true] %s41_s15 }
  0x25   :  { %p822_p3 = scmp.lt.u32.totalorder %s818_s19, %s971_s2 }
  0x27   :  { %p824_p4 = pnand %p822_p3, %p819_p2 }
  0x29   :  { %827 = shalt.err (!%p824_p4)
}
  0x2a   :  { %s828_s24 = scalar_lea.vmem %s42_s15, 2048  ;;  %p833_p6 = scmp.lt.s32.totalorder %s42_s15, %s42_s15 }
  0x2b   :  { %p829_p5 = scmp.ne.s32.totalorder %s42_s15, %s828_s24  ;;  %p834_p7 = scmp.lt.s32.totalorder %s828_s24, %s828_s24 }
  0x2d   :  { %p835_p8 = por %p834_p7, %p833_p6 }
  0x2f   :  { %p836_p9 = pnand %p835_p8, %p829_p5 }
  0x31   :  { %839 = shalt.err (!%p836_p9)
}
  0x32   :  { %47 = dma.hbm_to_vmem [thread:$0]  %s971_s2, 2048, %s42_s15, [#allocation7], %s870_s27, %s870_s27, %s871_s28  }
  0x33   :  { %862 = dma.done.wait [#allocation4], 2048  }
  0x34   :  { %863 = vsyncadd [#allocation4], 4294965248 }
  0x35   :  { %864 = dma.done.wait [#allocation7], 4096  }
  0x36   :  { %865 = vsyncadd [#allocation7], 4294963200  ;;  %v81_v0 = vld [vmem:[#allocation6] sm:$0xff]  ;;  %v82_v1 = vld [vmem:[#allocation6 + $0x8] sm:$0xff] }
  0x37   :  { %v83_v2 = vld [vmem:[#allocation6 + $0x10] sm:$0xff]  ;;  %v704_v3 = vpack.c.bf16 %v82_v1, %v81_v0  ;;  %v84_v4 = vld [vmem:[#allocation6 + $0x18] sm:$0xff]  ;;  %v85_v6 = vld [vmem:[#allocation6 + $0x20] sm:$0xff] }
  0x38   :  { %v708_v5 = vpack.c.bf16 %v84_v4, %v83_v2  ;;  %v86_v7 = vld [vmem:[#allocation6 + $0x28] sm:$0xff]  ;;  %v113_v9 = vld [vmem:[#allocation3] sm:$0xff]  ;;  %v87_v10 = vld [vmem:[#allocation6 + $0x30] sm:$0xff] }
  0x39   :  { %705 = vmatprep.subr.bf16.mxu0 %v704_v3  ;;  %v712_v8 = vpack.c.bf16 %v86_v7, %v85_v6  ;;  %v88_v11 = vld [vmem:[#allocation6 + $0x38] sm:$0xff]  ;;  %624 = vmatprep.mubr.f32.mxu0 %v113_v9  ;;  %v89_v13 = vld [vmem:[#allocation6 + $0x40] sm:$0xff]  ;;  %v90_v14 = vld [vmem:[#allocation6 + $0x48] sm:$0xff] }
  0x3a   :  { %707 = vmatpush3.bf16.msra.mxu0 %v704_v3  ;;  %v716_v12 = vpack.c.bf16 %v88_v11, %v87_v10  ;;  %v325_v15 = vld [vmem:[#allocation8] sm:$0xff]  ;;  %v326_v16 = vld [vmem:[#allocation8 + $0x8] sm:$0xff]  ;;  %v327_v17 = vld [vmem:[#allocation8 + $0x10] sm:$0xff]  ;;  %v720_v21 = vpack.c.bf16 %v90_v14, %v89_v13 }
  0x3b   :  { %709 = vmatprep.subr.bf16.mxu0 %v708_v5  ;;  %v328_v18 = vld [vmem:[#allocation8 + $0x18] sm:$0xff]  ;;  %v736_v19 = vpack.c.bf16 %v326_v16, %v325_v15  ;;  %v329_v22 = vld [vmem:[#allocation8 + $0x20] sm:$0xff]  ;;  %v330_v23 = vld [vmem:[#allocation8 + $0x28] sm:$0xff] }
  0x3c   :  { %v740_v20 = vpack.c.bf16 %v328_v18, %v327_v17  ;;  %v91_v24 = vld [vmem:[#allocation6 + $0x50] sm:$0xff]  ;;  %v92_v25 = vld [vmem:[#allocation6 + $0x58] sm:$0xff]  ;;  %v744_v26 = vpack.c.bf16 %v330_v23, %v329_v22  ;;  %v93_v30 = vld [vmem:[#allocation6 + $0x60] sm:$0xff] }
  0x3d   :  { %737 = vmatprep.subr.bf16.mxu1 %v736_v19  ;;  %v724_v27 = vpack.c.bf16 %v92_v25, %v91_v24  ;;  %v331_v28 = vld [vmem:[#allocation8 + $0x30] sm:$0xff]  ;;  %v332_v29 = vld [vmem:[#allocation8 + $0x38] sm:$0xff]  ;;  %v94_v31 = vld [vmem:[#allocation6 + $0x68] sm:$0xff] }
  0x3e   :  { %711 = vmatpush3.bf16.msra.mxu0 %v708_v5  ;;  %739 = vmatpush3.bf16.msra.mxu1 %v736_v19  ;;  %v748_v32 = vpack.c.bf16 %v332_v29, %v331_v28  ;;  %v728_v33 = vpack.c.bf16 %v94_v31, %v93_v30  ;;  %v333_v34 = vld [vmem:[#allocation8 + $0x40] sm:$0xff]  ;;  %v334_v35 = vld [vmem:[#allocation8 + $0x48] sm:$0xff]  ;;  %v95_v36 = vld [vmem:[#allocation6 + $0x70] sm:$0xff] }
  0x3f   :  { %713 = vmatprep.subr.bf16.mxu0 %v712_v8  ;;  %741 = vmatprep.subr.bf16.mxu1 %v740_v20  ;;  %v96_v37 = vld [vmem:[#allocation6 + $0x78] sm:$0xff]  ;;  %v752_v38 = vpack.c.bf16 %v334_v35, %v333_v34  ;;  %v335_v40 = vld [vmem:[#allocation8 + $0x50] sm:$0xff]  ;;  %v337_v43 = vld [vmem:[#allocation8 + $0x60] sm:$0xff] }
  0x40   :  { %v732_v39 = vpack.c.bf16 %v96_v37, %v95_v36  ;;  %v336_v41 = vld [vmem:[#allocation8 + $0x58] sm:$0xff]  ;;  %v338_v44 = vld [vmem:[#allocation8 + $0x68] sm:$0xff]  ;;  %v115_v47 = vld [vmem:[#allocation3 + $0x10] sm:$0xff] }
  0x41   :  { %v756_v42 = vpack.c.bf16 %v336_v41, %v335_v40  ;;  %v114_v45 = vld [vmem:[#allocation3 + $0x8] sm:$0xff]  ;;  %v760_v46 = vpack.c.bf16 %v338_v44, %v337_v43  ;;  %v339_v48 = vld [vmem:[#allocation8 + $0x70] sm:$0xff]  ;;  %v340_v49 = vld [vmem:[#allocation8 + $0x78] sm:$0xff] }
  0x42   :  { %715 = vmatpush3.bf16.msra.mxu0 %v712_v8  ;;  %743 = vmatpush3.bf16.msra.mxu1 %v740_v20  ;;  %v116_v50 = vld [vmem:[#allocation3 + $0x18] sm:$0xff]  ;;  %v764_v51 = vpack.c.bf16 %v340_v49, %v339_v48  ;;  %v117_v52 = vld [vmem:[#allocation3 + $0x20] sm:$0xff]  ;;  %v118_v53 = vld [vmem:[#allocation3 + $0x28] sm:$0xff] }
  0x43   :  { %717 = vmatprep.subr.bf16.mxu0 %v716_v12  ;;  %745 = vmatprep.subr.bf16.mxu1 %v744_v26  ;;  %v119_v54 = vld [vmem:[#allocation3 + $0x30] sm:$0xff]  ;;  %v120_v55 = vld [vmem:[#allocation3 + $0x38] sm:$0xff]  ;;  %v121_v56 = vld [vmem:[#allocation3 + $0x40] sm:$0xff] }
  0x44   :  { %v122_v57 = vld [vmem:[#allocation3 + $0x48] sm:$0xff]  ;;  %v123_v58 = vld [vmem:[#allocation3 + $0x50] sm:$0xff]  ;;  %v124_v59 = vld [vmem:[#allocation3 + $0x58] sm:$0xff] }
  0x45   :  { %v125_v60 = vld [vmem:[#allocation3 + $0x60] sm:$0xff]  ;;  %v126_v61 = vld [vmem:[#allocation3 + $0x68] sm:$0xff]  ;;  %v127_v62 = vld [vmem:[#allocation3 + $0x70] sm:$0xff] }
  0x46   :  { %719 = vmatpush3.bf16.msra.mxu0 %v716_v12  ;;  %747 = vmatpush3.bf16.msra.mxu1 %v744_v26  ;;  %v128_v63 = vld [vmem:[#allocation3 + $0x78] sm:$0xff]  ;;  %v527_v16 = vld [vmem:[%s972_s3] ss:$0 sm:$0xff]  ;;  %s873_s3 = smov [#allocation9]  }
  0x47   :  { %721 = vmatprep.subr.bf16.mxu0 %v720_v21  ;;  %749 = vmatprep.subr.bf16.mxu1 %v748_v32  ;;  %s514_s26 = sshll.u32 %s873_s3, 4  ;;  %s515_s26 = int_to_ptr.vmem [resolvable:$true] %s514_s26 }
  0x48   :  { %s840_s29 = scalar_lea.vmem %s515_s26, 2048  ;;  %p845_p11 = scmp.lt.s32.totalorder %s515_s26, %s515_s26 }
  0x49   :  { %p841_p10 = scmp.ne.s32.totalorder %s515_s26, %s840_s29  ;;  %p846_p12 = scmp.lt.s32.totalorder %s840_s29, %s840_s29 }
  0x4a   :  { %723 = vmatpush3.bf16.msra.mxu0 %v720_v21  ;;  %751 = vmatpush3.bf16.msra.mxu1 %v748_v32 }
  0x4b   :  { %725 = vmatprep.subr.bf16.mxu0 %v724_v27  ;;  %753 = vmatprep.subr.bf16.mxu1 %v752_v38  ;;  %p847_p13 = por %p846_p12, %p845_p11 }
  0x4d   :  { %p848_p0 = pnand %p847_p13, %p841_p10 }
  0x4e   :  { %727 = vmatpush3.bf16.msra.mxu0 %v724_v27  ;;  %755 = vmatpush3.bf16.msra.mxu1 %v752_v38 }
  0x4f   :  { %729 = vmatprep.subr.bf16.mxu0 %v728_v33  ;;  %757 = vmatprep.subr.bf16.mxu1 %v756_v42 }
  0x52   :  { %731 = vmatpush3.bf16.msra.mxu0 %v728_v33  ;;  %759 = vmatpush3.bf16.msra.mxu1 %v756_v42 }
  0x53   :  { %733 = vmatprep.subr.bf16.mxu0 %v732_v39  ;;  %761 = vmatprep.subr.bf16.mxu1 %v760_v46 }
  0x56   :  { %735 = vmatpush3.bf16.msra.mxu0 %v732_v39  ;;  %763 = vmatpush3.bf16.msra.mxu1 %v760_v46 }
  0x57   :  { %765 = vmatprep.subr.bf16.mxu1 %v764_v51 }
  0x59   :  { %625 = vmatmul.mubr.f32.vlgmr.msra.gmra.mrb[0].mxu0 %v114_v45 }
  0x5a   :  { %627 = vmatprep.mubr.f32.mxu0 %v115_v47  ;;  %767 = vmatpush3.bf16.msra.mxu1 %v764_v51 }
  0x5d   :  { %628 = vmatmul.mubr.f32.gmra.mrb[2].mxu0 %v116_v50 }
  0x5e   :  { %630 = vmatprep.mubr.f32.mxu0 %v117_v52 }
  0x61   :  { %631 = vmatmul.mubr.f32.gmra.mrb[4].mxu0 %v118_v53 }
  0x62   :  { %633 = vmatprep.mubr.f32.mxu0 %v119_v54 }
  0x65   :  { %634 = vmatmul.mubr.f32.gmra.mrb[6].mxu0 %v120_v55 }
  0x66   :  { %636 = vmatprep.mubr.f32.mxu0 %v121_v56 }
  0x69   :  { %637 = vmatmul.mubr.f32.gmra.mrb[8].mxu0 %v122_v57 }
  0x6a   :  { %639 = vmatprep.mubr.f32.mxu0 %v123_v58 }
  0x6d   :  { %640 = vmatmul.mubr.f32.gmra.mrb[10].mxu0 %v124_v59 }
  0x6e   :  { %642 = vmatprep.mubr.f32.mxu0 %v125_v60 }
  0x71   :  { %643 = vmatmul.mubr.f32.gmra.mrb[12].mxu0 %v126_v61 }
  0x72   :  { %645 = vmatprep.mubr.f32.mxu0 %v127_v62 }
  0x75   :  { %646 = vmatmul.mubr.f32.gmra.mrb[14].mxu0 %v128_v63 }
 0x12c   :  { %v626_v0 = vpop.f32.mrb[0].mxu0 }
 0x12d   :  { %v195_v1 = vpop.f32.mrb[1].mxu0 }
 0x12e   :  { %680 = vmatprep.mubr.f32.mxu1 %v195_v1 }
 0x12f   :  { %681 = vmatmul.mubr.f32.vlgmr.msra.gmra.mrb[0].mxu1 %v626_v0 }
 0x130   :  { %v629_v2 = vpop.f32.mrb[2].mxu0 }
 0x131   :  { %v205_v3 = vpop.f32.mrb[3].mxu0 }
 0x132   :  { %683 = vmatprep.mubr.f32.mxu1 %v205_v3 }
 0x133   :  { %684 = vmatmul.mubr.f32.gmra.mrb[2].mxu1 %v629_v2 }
 0x134   :  { %v632_v4 = vpop.f32.mrb[4].mxu0 }
 0x135   :  { %v215_v5 = vpop.f32.mrb[5].mxu0 }
 0x136   :  { %686 = vmatprep.mubr.f32.mxu1 %v215_v5 }
 0x137   :  { %687 = vmatmul.mubr.f32.gmra.mrb[4].mxu1 %v632_v4 }
 0x138   :  { %v635_v6 = vpop.f32.mrb[6].mxu0 }
 0x139   :  { %v225_v7 = vpop.f32.mrb[7].mxu0 }
 0x13a   :  { %689 = vmatprep.mubr.f32.mxu1 %v225_v7 }
 0x13b   :  { %690 = vmatmul.mubr.f32.gmra.mrb[6].mxu1 %v635_v6 }
 0x13c   :  { %v638_v8 = vpop.f32.mrb[8].mxu0 }
 0x13d   :  { %v235_v9 = vpop.f32.mrb[9].mxu0 }
 0x13e   :  { %692 = vmatprep.mubr.f32.mxu1 %v235_v9 }
 0x13f   :  { %693 = vmatmul.mubr.f32.gmra.mrb[8].mxu1 %v638_v8 }
 0x140   :  { %v641_v10 = vpop.f32.mrb[10].mxu0 }
 0x141   :  { %v245_v11 = vpop.f32.mrb[11].mxu0 }
 0x142   :  { %695 = vmatprep.mubr.f32.mxu1 %v245_v11 }
 0x143   :  { %696 = vmatmul.mubr.f32.gmra.mrb[10].mxu1 %v641_v10 }
 0x144   :  { %v644_v12 = vpop.f32.mrb[12].mxu0 }
 0x145   :  { %v255_v13 = vpop.f32.mrb[13].mxu0 }
 0x146   :  { %698 = vmatprep.mubr.f32.mxu1 %v255_v13 }
 0x147   :  { %699 = vmatmul.mubr.f32.gmra.mrb[12].mxu1 %v644_v12 }
 0x148   :  { %v647_v14 = vpop.f32.mrb[14].mxu0 }
 0x149   :  { %v265_v15 = vpop.f32.mrb[15].mxu0 }
 0x14a   :  { %701 = vmatprep.mubr.f32.mxu1 %v265_v15 }
 0x14b   :  { %702 = vmatmul.mubr.f32.gmra.mrb[14].mxu1 %v647_v14 }
 0x202   :  { %v682_v17 = vpop.f32.mrb[0].mxu1 }
 0x203   :  { %v420_v18 = vadd.f32 %v682_v17, %v527_v16  ;;  %v414_v19 = vpop.f32.mrb[1].mxu1 }
 0x204   :  { %v415_v20 = vadd.f32 %v527_v16, %v414_v19 }
 0x205   :  { %494 = vst [vmem:[#allocation9 + $0x8] sm:$0xff] %v420_v18 }
 0x206   :  { %493 = vst [vmem:[#allocation9] sm:$0xff] %v415_v20  ;;  %v685_v21 = vpop.f32.mrb[2].mxu1 }
 0x207   :  { %v430_v22 = vadd.f32 %v685_v21, %v527_v16  ;;  %v424_v23 = vpop.f32.mrb[3].mxu1 }
 0x208   :  { %v425_v24 = vadd.f32 %v527_v16, %v424_v23 }
 0x209   :  { %496 = vst [vmem:[#allocation9 + $0x18] sm:$0xff] %v430_v22 }
 0x20a   :  { %495 = vst [vmem:[#allocation9 + $0x10] sm:$0xff] %v425_v24  ;;  %v688_v25 = vpop.f32.mrb[4].mxu1 }
 0x20b   :  { %v440_v26 = vadd.f32 %v688_v25, %v527_v16  ;;  %v434_v27 = vpop.f32.mrb[5].mxu1 }
 0x20c   :  { %v435_v28 = vadd.f32 %v527_v16, %v434_v27 }
 0x20d   :  { %498 = vst [vmem:[#allocation9 + $0x28] sm:$0xff] %v440_v26 }
 0x20e   :  { %497 = vst [vmem:[#allocation9 + $0x20] sm:$0xff] %v435_v28  ;;  %v691_v29 = vpop.f32.mrb[6].mxu1 }
 0x20f   :  { %v450_v30 = vadd.f32 %v691_v29, %v527_v16  ;;  %v444_v31 = vpop.f32.mrb[7].mxu1 }
 0x210   :  { %v445_v32 = vadd.f32 %v527_v16, %v444_v31 }
 0x211   :  { %500 = vst [vmem:[#allocation9 + $0x38] sm:$0xff] %v450_v30 }
 0x212   :  { %499 = vst [vmem:[#allocation9 + $0x30] sm:$0xff] %v445_v32  ;;  %v694_v33 = vpop.f32.mrb[8].mxu1 }
 0x213   :  { %v460_v34 = vadd.f32 %v694_v33, %v527_v16  ;;  %v454_v35 = vpop.f32.mrb[9].mxu1 }
 0x214   :  { %v455_v36 = vadd.f32 %v527_v16, %v454_v35 }
 0x215   :  { %502 = vst [vmem:[#allocation9 + $0x48] sm:$0xff] %v460_v34 }
 0x216   :  { %501 = vst [vmem:[#allocation9 + $0x40] sm:$0xff] %v455_v36  ;;  %v697_v37 = vpop.f32.mrb[10].mxu1 }
 0x217   :  { %v470_v38 = vadd.f32 %v697_v37, %v527_v16  ;;  %v464_v39 = vpop.f32.mrb[11].mxu1 }
 0x218   :  { %v465_v40 = vadd.f32 %v527_v16, %v464_v39 }
 0x219   :  { %504 = vst [vmem:[#allocation9 + $0x58] sm:$0xff] %v470_v38 }
 0x21a   :  { %503 = vst [vmem:[#allocation9 + $0x50] sm:$0xff] %v465_v40  ;;  %v700_v41 = vpop.f32.mrb[12].mxu1 }
 0x21b   :  { %v480_v42 = vadd.f32 %v700_v41, %v527_v16  ;;  %v474_v43 = vpop.f32.mrb[13].mxu1 }
 0x21c   :  { %v475_v44 = vadd.f32 %v527_v16, %v474_v43 }
 0x21d   :  { %506 = vst [vmem:[#allocation9 + $0x68] sm:$0xff] %v480_v42 }
 0x21e   :  { %505 = vst [vmem:[#allocation9 + $0x60] sm:$0xff] %v475_v44  ;;  %v703_v45 = vpop.f32.mrb[14].mxu1 }
 0x21f   :  { %v490_v46 = vadd.f32 %v703_v45, %v527_v16  ;;  %v484_v47 = vpop.f32.mrb[15].mxu1 }
 0x220   :  { %v485_v48 = vadd.f32 %v527_v16, %v484_v47 }
 0x221   :  { %508 = vst [vmem:[#allocation9 + $0x78] sm:$0xff] %v490_v46 }
 0x222   :  { %507 = vst [vmem:[#allocation9 + $0x70] sm:$0xff] %v485_v48 }
 0x223   :  { %851 = shalt.err (!%p848_p0)
}
 0x224   :  { %s852_s6 = scalar_lea.hbm %s973_s4, 2048 }
 0x225   :  { %p853_p1 = scmp.ne.s32.totalorder %s973_s4, %s852_s6  ;;  %p856_p2 = scmp.lt.u32.totalorder %s852_s6, %s973_s4 }
 0x227   :  { %p858_p3 = pnand %p856_p2, %p853_p1 }
 0x229   :  { %861 = shalt.err (!%p858_p3)
}
 0x22a   :  { %520 = dma.vmem_to_hbm [thread:$0]  %s515_s26, 2048, %s973_s4, [#allocation5], %s870_s27, %s870_s27, %s871_s28  }
 0x22b   :  { %866 = dma.done.wait [#allocation5], 2048  }
 0x22c   :  { %867 = vsyncadd [#allocation5], 4294965248 }
 0x22d   :  { %524 = vsyncpa [#allocation4], 1 }
 0x22e   :  { %525 = vsyncpa [#allocation7], 1 }
 0x22f   :  { %526 = vsyncpa [#allocation5], 1 }

</bundles_post_ra>
